<compile_context>
chip_gen: v7x
topology: tpu7x:2x2x1
jax: 0.10.0
libtpu: 0.0.40
codegen_flags: <defaults>
</compile_context>

<pallas_src>
import functools

import jax
import jax.numpy as jnp
from jax.experimental import pallas as pl
from jax.experimental.pallas import tpu as pltpu


def _residual_block_kernel(x_ref, w1_ref, b1_ref, w2_ref, b2_ref, o_ref,
                           xpad_ref, p_ref, *, C, H, W):
    # x_ref    : (1, C, H*W)            f32   flattened NCHW input, one batch elem
    # w*_ref   : (C, 9*C)               bf16  weights packed as [co, (kh*3+kw)*C + ci]
    # b*_ref   : (C, 1)                 f32
    # o_ref    : (1, C, H*W)            f32   flattened NCHW output
    # xpad_ref : (C, H*W + 2*(W+1))     f32   zero-bordered flat image scratch
    # p_ref    : (9*C, H*W)             f32   im2col patch-matrix scratch
    HW = H * W
    PAD = W + 1  # zero border on each side of the flat image

    # Column-validity lane masks: taps with dw = -1 / +1 must not use pixels
    # that wrapped across a row boundary.  Row over/underflow needs no mask —
    # it lands in the zero border of xpad_ref.
    col = jax.lax.broadcasted_iota(jnp.int32, (C, HW), 1) % W
    left_ok = col >= 1          # used when dw == -1
    right_ok = col <= W - 2     # used when dw == +1

    taps = [(kh, kw) for kh in range(3) for kw in range(3)]

    def conv3x3(src, w_ref, b_ref):
        # src: (C, HW) f32, logically (C, H, W) row-major.
        xpad_ref[:, PAD:PAD + HW] = src
        # Build the (9*C, HW) im2col matrix from 9 statically shifted views.
        for t, (kh, kw) in enumerate(taps):
            dh, dw = kh - 1, kw - 1
            s = dh * W + dw
            shifted = xpad_ref[:, PAD + s:PAD + s + HW]     # (C, HW)
            if dw == -1:
                shifted = jnp.where(left_ok, shifted, 0.0)
            elif dw == 1:
                shifted = jnp.where(right_ok, shifted, 0.0)
            p_ref[t * C:(t + 1) * C, :] = shifted
        # Single lane-dense MXU matmul: (C, 9C) @ (9C, HW), K = 9*C.
        acc = jnp.dot(w_ref[...], p_ref[...].astype(jnp.bfloat16),
                      preferred_element_type=jnp.float32)   # (C, HW) f32
        return acc + b_ref[...]

    # Zero the padded scratch once per grid step; only its interior is ever
    # rewritten, so the halo border stays zero for both convolutions.
    xpad_ref[...] = jnp.zeros_like(xpad_ref)

    x = x_ref[0]                                            # (C, HW) f32
    y1 = jnp.maximum(conv3x3(x, w1_ref, b1_ref), 0.0)       # conv1 + ReLU
    y2 = conv3x3(y1, w2_ref, b2_ref)                        # conv2 (+ bias)
    o_ref[0] = (y2 * 0.1 + x).astype(o_ref.dtype)           # scale + residual


def residual_block(x, w1, b1, w2, b2):
    """ResidualBlock forward.

    x : (N, C, H, W) float32
    w1, w2 : (C, C, 3, 3) PyTorch Conv2d weights (OIHW)
    b1, b2 : (C,) biases
    """
    N, C, H, W = x.shape
    HW = H * W
    x_flat = x.astype(jnp.float32).reshape(N, C, HW)        # free reshape (NCHW order)

    def pack_w(w):
        # (co, ci, kh, kw) -> (co, (kh*3+kw)*C + ci), bf16 for the MXU.
        return jnp.transpose(w, (0, 2, 3, 1)).reshape(C, 9 * C).astype(jnp.bfloat16)

    w1p, w2p = pack_w(w1), pack_w(w2)
    b1c = b1.reshape(C, 1).astype(jnp.float32)
    b2c = b2.reshape(C, 1).astype(jnp.float32)

    kernel = functools.partial(_residual_block_kernel, C=C, H=H, W=W)

    out_flat = pl.pallas_call(
        kernel,
        out_shape=jax.ShapeDtypeStruct((N, C, HW), jnp.float32),
        grid_spec=pltpu.PrefetchScalarGridSpec(
            num_scalar_prefetch=0,
            grid=(N,),
            in_specs=[
                pl.BlockSpec((1, C, HW), lambda n: (n, 0, 0)),   # x (per batch)
                pl.BlockSpec((C, 9 * C), lambda n: (0, 0)),      # w1 (resident)
                pl.BlockSpec((C, 1), lambda n: (0, 0)),          # b1
                pl.BlockSpec((C, 9 * C), lambda n: (0, 0)),      # w2 (resident)
                pl.BlockSpec((C, 1), lambda n: (0, 0)),          # b2
            ],
            out_specs=pl.BlockSpec((1, C, HW), lambda n: (n, 0, 0)),
            scratch_shapes=[
                pltpu.VMEM((C, HW + 2 * (W + 1)), jnp.float32),  # zero-bordered image
                pltpu.VMEM((9 * C, HW), jnp.float32),            # im2col patches
            ],
        ),
        compiler_params=pltpu.CompilerParams(dimension_semantics=("parallel",)),
    )(x_flat, w1p, b1c, w2p, b2c)

    return out_flat.reshape(N, C, H, W)


def _reference(x, w1, b1, w2, b2):
    """Pure-JAX f32 reference of the PyTorch ResidualBlock forward."""
    dn = ("NCHW", "OIHW", "NCHW")

    def conv(v, w, b):
        y = jax.lax.conv_general_dilated(v, w, window_strides=(1, 1),
                                         padding=((1, 1), (1, 1)),
                                         dimension_numbers=dn)
        return y + b[None, :, None, None]

    y = jnp.maximum(conv(x, w1, b1), 0.0)
    return conv(y, w2, b2) * 0.1 + x


if __name__ == "__main__":
    # ResidualBlock(channels=4) on a (2, 4, 16, 16) input.
    N, C, H, W = 2, 4, 16, 16

    key = jax.random.PRNGKey(0)
    k1, k2, k3, k4, k5 = jax.random.split(key, 5)
    x = jax.random.normal(k1, (N, C, H, W), jnp.float32)
    w1 = jax.random.normal(k2, (C, C, 3, 3), jnp.float32) * 0.1
    b1 = jax.random.normal(k3, (C,), jnp.float32) * 0.1
    w2 = jax.random.normal(k4, (C, C, 3, 3), jnp.float32) * 0.1
    b2 = jax.random.normal(k5, (C,), jnp.float32) * 0.1

    out = residual_block(x, w1, b1, w2, b2)
    out = jax.block_until_ready(out)

    ref = _reference(x, w1, b1, w2, b2)
    assert out.shape == (N, C, H, W)
    err = float(jnp.max(jnp.abs(out - ref)))
    # bf16 MXU inputs with f32 accumulation -> small tolerance vs f32 reference.
    assert err < 1e-2, f"mismatch vs reference: max abs diff = {err}"

    print("KERNEL_OK")
</pallas_src>

<mosaic_0001>
module attributes {stable_mosaic.version = 11 : i64} {
  func.func @_residual_block_kernel(%arg0: i32, %arg1: memref<1x4x256xf32, #tpu.memory_space<vmem>>, %arg2: memref<4x36xbf16, #tpu.memory_space<vmem>>, %arg3: memref<4x1xf32, #tpu.memory_space<vmem>>, %arg4: memref<4x36xbf16, #tpu.memory_space<vmem>>, %arg5: memref<4x1xf32, #tpu.memory_space<vmem>>, %arg6: memref<1x4x256xf32, #tpu.memory_space<vmem>>, %arg7: memref<4x290xf32, #tpu.memory_space<vmem>>, %arg8: memref<36x256xf32, #tpu.memory_space<vmem>>) attributes {dimension_semantics = [#tpu.dimension_semantics<parallel>], iteration_bounds = array<i64: 2>, scalar_prefetch = 0 : i64, scratch_operands = 2 : i64, tpu.core_type = #tpu.core_type<tc>, window_params = [{transform_indices = @transform_0, window_bounds = array<i64: 1, 4, 256>}, {pipeline_mode = #tpu.pipeline_mode<synchronous>, transform_indices = @transform_1, window_bounds = array<i64: 4, 36>}, {pipeline_mode = #tpu.pipeline_mode<synchronous>, transform_indices = @transform_2, window_bounds = array<i64: 4, 1>}, {pipeline_mode = #tpu.pipeline_mode<synchronous>, transform_indices = @transform_3, window_bounds = array<i64: 4, 36>}, {pipeline_mode = #tpu.pipeline_mode<synchronous>, transform_indices = @transform_4, window_bounds = array<i64: 4, 1>}, {transform_indices = @transform_5, window_bounds = array<i64: 1, 4, 256>}]} {
    %0 = tpu.iota {dimensions = array<i32: 1>} : vector<4x256xi32>
    %c16_i32 = arith.constant 16 : i32
    %c0_i32 = arith.constant 0 : i32
    %1 = arith.cmpi eq, %c16_i32, %c0_i32 : i32
    %c1_i32 = arith.constant 1 : i32
    %2 = arith.select %1, %c1_i32, %c16_i32 : i32
    %3 = vector.broadcast %2 : i32 to vector<4x256xi32>
    %4 = arith.remsi %0, %3 : vector<4x256xi32>
    %c0_i32_0 = arith.constant 0 : i32
    %5 = vector.broadcast %c0_i32_0 : i32 to vector<4x256xi32>
    %6 = arith.cmpi ne, %4, %5 : vector<4x256xi32>
    %c0_i32_1 = arith.constant 0 : i32
    %7 = vector.broadcast %c0_i32_1 : i32 to vector<4x256xi32>
    %8 = arith.cmpi slt, %4, %7 : vector<4x256xi32>
    %c0_i32_2 = arith.constant 0 : i32
    %9 = arith.cmpi slt, %2, %c0_i32_2 : i32
    %10 = vector.broadcast %9 : i1 to vector<4x256xi1>
    %11 = vector.broadcast %10 : vector<4x256xi1> to vector<4x256xi1>
    %12 = arith.xori %8, %11 : vector<4x256xi1>
    %13 = arith.andi %12, %6 : vector<4x256xi1>
    %14 = vector.broadcast %2 : i32 to vector<4x256xi32>
    %15 = arith.addi %4, %14 : vector<4x256xi32>
    %16 = arith.select %13, %15, %4 : vector<4x256xi1>, vector<4x256xi32>
    %c1_i32_3 = arith.constant 1 : i32
    %17 = vector.broadcast %c1_i32_3 : i32 to vector<4x256xi32>
    %18 = arith.cmpi sge, %16, %17 : vector<4x256xi32>
    %c14_i32 = arith.constant 14 : i32
    %19 = vector.broadcast %c14_i32 : i32 to vector<4x256xi32>
    %20 = arith.cmpi sle, %16, %19 : vector<4x256xi32>
    %cst = arith.constant 0.000000e+00 : f32
    %21 = vector.broadcast %cst : f32 to vector<4x290xf32>
    %c0 = arith.constant 0 : index
    %c0_4 = arith.constant 0 : index
    %22 = vector.load %arg7[%c0, %c0_4] : memref<4x290xf32, #tpu.memory_space<vmem>>, vector<4x290xf32>
    tpu.vector_store %arg7[%c0, %c0_4], %21 {strides = array<i32>} : memref<4x290xf32, #tpu.memory_space<vmem>>, vector<4x290xf32>,
    %c0_5 = arith.constant 0 : index
    %c0_6 = arith.constant 0 : index
    %c0_7 = arith.constant 0 : index
    %23 = vector.load %arg1[%c0_5, %c0_6, %c0_7] : memref<1x4x256xf32, #tpu.memory_space<vmem>>, vector<1x4x256xf32>
    %24 = vector.shape_cast %23 : vector<1x4x256xf32> to vector<4x256xf32>
    %c0_8 = arith.constant 0 : index
    %c17 = arith.constant 17 : index
    %25 = vector.load %arg7[%c0_8, %c17] : memref<4x290xf32, #tpu.memory_space<vmem>>, vector<4x256xf32>
    tpu.vector_store %arg7[%c0_8, %c17], %24 {strides = array<i32>} : memref<4x290xf32, #tpu.memory_space<vmem>>, vector<4x256xf32>,
    %c0_9 = arith.constant 0 : index
    %c0_10 = arith.constant 0 : index
    %26 = vector.load %arg7[%c0_9, %c0_10] : memref<4x290xf32, #tpu.memory_space<vmem>>, vector<4x256xf32>
    %cst_11 = arith.constant 0.000000e+00 : f32
    %27 = vector.broadcast %cst_11 : f32 to vector<4x256xf32>
    %28 = arith.select %18, %26, %27 : vector<4x256xi1>, vector<4x256xf32>
    %c0_12 = arith.constant 0 : index
    %c0_13 = arith.constant 0 : index
    %29 = vector.load %arg8[%c0_12, %c0_13] : memref<36x256xf32, #tpu.memory_space<vmem>>, vector<4x256xf32>
    tpu.vector_store %arg8[%c0_12, %c0_13], %28 {strides = array<i32>} : memref<36x256xf32, #tpu.memory_space<vmem>>, vector<4x256xf32>,
    %c0_14 = arith.constant 0 : index
    %c1 = arith.constant 1 : index
    %30 = vector.load %arg7[%c0_14, %c1] : memref<4x290xf32, #tpu.memory_space<vmem>>, vector<4x256xf32>
    %c4 = arith.constant 4 : index
    %c0_15 = arith.constant 0 : index
    %31 = vector.load %arg8[%c4, %c0_15] : memref<36x256xf32, #tpu.memory_space<vmem>>, vector<4x256xf32>
    tpu.vector_store %arg8[%c4, %c0_15], %30 {strides = array<i32>} : memref<36x256xf32, #tpu.memory_space<vmem>>, vector<4x256xf32>,
    %c0_16 = arith.constant 0 : index
    %c2 = arith.constant 2 : index
    %32 = vector.load %arg7[%c0_16, %c2] : memref<4x290xf32, #tpu.memory_space<vmem>>, vector<4x256xf32>
    %cst_17 = arith.constant 0.000000e+00 : f32
    %33 = vector.broadcast %cst_17 : f32 to vector<4x256xf32>
    %34 = arith.select %20, %32, %33 : vector<4x256xi1>, vector<4x256xf32>
    %c8 = arith.constant 8 : index
    %c0_18 = arith.constant 0 : index
    %35 = vector.load %arg8[%c8, %c0_18] : memref<36x256xf32, #tpu.memory_space<vmem>>, vector<4x256xf32>
    tpu.vector_store %arg8[%c8, %c0_18], %34 {strides = array<i32>} : memref<36x256xf32, #tpu.memory_space<vmem>>, vector<4x256xf32>,
    %c0_19 = arith.constant 0 : index
    %c16 = arith.constant 16 : index
    %36 = vector.load %arg7[%c0_19, %c16] : memref<4x290xf32, #tpu.memory_space<vmem>>, vector<4x256xf32>
    %cst_20 = arith.constant 0.000000e+00 : f32
    %37 = vector.broadcast %cst_20 : f32 to vector<4x256xf32>
    %38 = arith.select %18, %36, %37 : vector<4x256xi1>, vector<4x256xf32>
    %c12 = arith.constant 12 : index
    %c0_21 = arith.constant 0 : index
    %39 = vector.load %arg8[%c12, %c0_21] : memref<36x256xf32, #tpu.memory_space<vmem>>, vector<4x256xf32>
    tpu.vector_store %arg8[%c12, %c0_21], %38 {strides = array<i32>} : memref<36x256xf32, #tpu.memory_space<vmem>>, vector<4x256xf32>,
    %c0_22 = arith.constant 0 : index
    %c17_23 = arith.constant 17 : index
    %40 = vector.load %arg7[%c0_22, %c17_23] : memref<4x290xf32, #tpu.memory_space<vmem>>, vector<4x256xf32>
    %c16_24 = arith.constant 16 : index
    %c0_25 = arith.constant 0 : index
    %41 = vector.load %arg8[%c16_24, %c0_25] : memref<36x256xf32, #tpu.memory_space<vmem>>, vector<4x256xf32>
    tpu.vector_store %arg8[%c16_24, %c0_25], %40 {strides = array<i32>} : memref<36x256xf32, #tpu.memory_space<vmem>>, vector<4x256xf32>,
    %c0_26 = arith.constant 0 : index
    %c18 = arith.constant 18 : index
    %42 = vector.load %arg7[%c0_26, %c18] : memref<4x290xf32, #tpu.memory_space<vmem>>, vector<4x256xf32>
    %cst_27 = arith.constant 0.000000e+00 : f32
    %43 = vector.broadcast %cst_27 : f32 to vector<4x256xf32>
    %44 = arith.select %20, %42, %43 : vector<4x256xi1>, vector<4x256xf32>
    %c20 = arith.constant 20 : index
    %c0_28 = arith.constant 0 : index
    %45 = vector.load %arg8[%c20, %c0_28] : memref<36x256xf32, #tpu.memory_space<vmem>>, vector<4x256xf32>
    tpu.vector_store %arg8[%c20, %c0_28], %44 {strides = array<i32>} : memref<36x256xf32, #tpu.memory_space<vmem>>, vector<4x256xf32>,
    %c0_29 = arith.constant 0 : index
    %c32 = arith.constant 32 : index
    %46 = vector.load %arg7[%c0_29, %c32] : memref<4x290xf32, #tpu.memory_space<vmem>>, vector<4x256xf32>
    %cst_30 = arith.constant 0.000000e+00 : f32
    %47 = vector.broadcast %cst_30 : f32 to vector<4x256xf32>
    %48 = arith.select %18, %46, %47 : vector<4x256xi1>, vector<4x256xf32>
    %c24 = arith.constant 24 : index
    %c0_31 = arith.constant 0 : index
    %49 = vector.load %arg8[%c24, %c0_31] : memref<36x256xf32, #tpu.memory_space<vmem>>, vector<4x256xf32>
    tpu.vector_store %arg8[%c24, %c0_31], %48 {strides = array<i32>} : memref<36x256xf32, #tpu.memory_space<vmem>>, vector<4x256xf32>,
    %c0_32 = arith.constant 0 : index
    %c33 = arith.constant 33 : index
    %50 = vector.load %arg7[%c0_32, %c33] : memref<4x290xf32, #tpu.memory_space<vmem>>, vector<4x256xf32>
    %c28 = arith.constant 28 : index
    %c0_33 = arith.constant 0 : index
    %51 = vector.load %arg8[%c28, %c0_33] : memref<36x256xf32, #tpu.memory_space<vmem>>, vector<4x256xf32>
    tpu.vector_store %arg8[%c28, %c0_33], %50 {strides = array<i32>} : memref<36x256xf32, #tpu.memory_space<vmem>>, vector<4x256xf32>,
    %c0_34 = arith.constant 0 : index
    %c34 = arith.constant 34 : index
    %52 = vector.load %arg7[%c0_34, %c34] : memref<4x290xf32, #tpu.memory_space<vmem>>, vector<4x256xf32>
    %cst_35 = arith.constant 0.000000e+00 : f32
    %53 = vector.broadcast %cst_35 : f32 to vector<4x256xf32>
    %54 = arith.select %20, %52, %53 : vector<4x256xi1>, vector<4x256xf32>
    %c32_36 = arith.constant 32 : index
    %c0_37 = arith.constant 0 : index
    %55 = vector.load %arg8[%c32_36, %c0_37] : memref<36x256xf32, #tpu.memory_space<vmem>>, vector<4x256xf32>
    tpu.vector_store %arg8[%c32_36, %c0_37], %54 {strides = array<i32>} : memref<36x256xf32, #tpu.memory_space<vmem>>, vector<4x256xf32>,
    %c0_38 = arith.constant 0 : index
    %c0_39 = arith.constant 0 : index
    %56 = vector.load %arg2[%c0_38, %c0_39] : memref<4x36xbf16, #tpu.memory_space<vmem>>, vector<4x36xbf16>
    %c0_40 = arith.constant 0 : index
    %c0_41 = arith.constant 0 : index
    %57 = vector.load %arg8[%c0_40, %c0_41] : memref<36x256xf32, #tpu.memory_space<vmem>>, vector<36x256xf32>
    %58 = arith.truncf %57 : vector<36x256xf32> to vector<36x256xbf16>
    %cst_42 = arith.constant dense<0.000000e+00> : vector<4x256xf32>
    %59 = tpu.matmul %56, %58, %cst_42 {dimension_numbers = #tpu.dot_dimension_numbers<[1], [0], [0], [1], [0, 0, 1, 1], [], []>} : vector<4x36xbf16>, vector<36x256xbf16>, vector<4x256xf32> -> vector<4x256xf32>
    %c0_43 = arith.constant 0 : index
    %c0_44 = arith.constant 0 : index
    %60 = vector.load %arg3[%c0_43, %c0_44] : memref<4x1xf32, #tpu.memory_space<vmem>>, vector<4x1xf32>
    %61 = vector.broadcast %60 : vector<4x1xf32> to vector<4x256xf32>
    %62 = arith.addf %59, %61 : vector<4x256xf32>
    %cst_45 = arith.constant 0.000000e+00 : f32
    %63 = vector.broadcast %cst_45 : f32 to vector<4x256xf32>
    %64 = arith.maximumf %62, %63 : vector<4x256xf32>
    %c0_46 = arith.constant 0 : index
    %c17_47 = arith.constant 17 : index
    %65 = vector.load %arg7[%c0_46, %c17_47] : memref<4x290xf32, #tpu.memory_space<vmem>>, vector<4x256xf32>
    tpu.vector_store %arg7[%c0_46, %c17_47], %64 {strides = array<i32>} : memref<4x290xf32, #tpu.memory_space<vmem>>, vector<4x256xf32>,
    %c0_48 = arith.constant 0 : index
    %c0_49 = arith.constant 0 : index
    %66 = vector.load %arg7[%c0_48, %c0_49] : memref<4x290xf32, #tpu.memory_space<vmem>>, vector<4x256xf32>
    %cst_50 = arith.constant 0.000000e+00 : f32
    %67 = vector.broadcast %cst_50 : f32 to vector<4x256xf32>
    %68 = arith.select %18, %66, %67 : vector<4x256xi1>, vector<4x256xf32>
    %c0_51 = arith.constant 0 : index
    %c0_52 = arith.constant 0 : index
    %69 = vector.load %arg8[%c0_51, %c0_52] : memref<36x256xf32, #tpu.memory_space<vmem>>, vector<4x256xf32>
    tpu.vector_store %arg8[%c0_51, %c0_52], %68 {strides = array<i32>} : memref<36x256xf32, #tpu.memory_space<vmem>>, vector<4x256xf32>,
    %c0_53 = arith.constant 0 : index
    %c1_54 = arith.constant 1 : index
    %70 = vector.load %arg7[%c0_53, %c1_54] : memref<4x290xf32, #tpu.memory_space<vmem>>, vector<4x256xf32>
    %c4_55 = arith.constant 4 : index
    %c0_56 = arith.constant 0 : index
    %71 = vector.load %arg8[%c4_55, %c0_56] : memref<36x256xf32, #tpu.memory_space<vmem>>, vector<4x256xf32>
    tpu.vector_store %arg8[%c4_55, %c0_56], %70 {strides = array<i32>} : memref<36x256xf32, #tpu.memory_space<vmem>>, vector<4x256xf32>,
    %c0_57 = arith.constant 0 : index
    %c2_58 = arith.constant 2 : index
    %72 = vector.load %arg7[%c0_57, %c2_58] : memref<4x290xf32, #tpu.memory_space<vmem>>, vector<4x256xf32>
    %cst_59 = arith.constant 0.000000e+00 : f32
    %73 = vector.broadcast %cst_59 : f32 to vector<4x256xf32>
    %74 = arith.select %20, %72, %73 : vector<4x256xi1>, vector<4x256xf32>
    %c8_60 = arith.constant 8 : index
    %c0_61 = arith.constant 0 : index
    %75 = vector.load %arg8[%c8_60, %c0_61] : memref<36x256xf32, #tpu.memory_space<vmem>>, vector<4x256xf32>
    tpu.vector_store %arg8[%c8_60, %c0_61], %74 {strides = array<i32>} : memref<36x256xf32, #tpu.memory_space<vmem>>, vector<4x256xf32>,
    %c0_62 = arith.constant 0 : index
    %c16_63 = arith.constant 16 : index
    %76 = vector.load %arg7[%c0_62, %c16_63] : memref<4x290xf32, #tpu.memory_space<vmem>>, vector<4x256xf32>
    %cst_64 = arith.constant 0.000000e+00 : f32
    %77 = vector.broadcast %cst_64 : f32 to vector<4x256xf32>
    %78 = arith.select %18, %76, %77 : vector<4x256xi1>, vector<4x256xf32>
    %c12_65 = arith.constant 12 : index
    %c0_66 = arith.constant 0 : index
    %79 = vector.load %arg8[%c12_65, %c0_66] : memref<36x256xf32, #tpu.memory_space<vmem>>, vector<4x256xf32>
    tpu.vector_store %arg8[%c12_65, %c0_66], %78 {strides = array<i32>} : memref<36x256xf32, #tpu.memory_space<vmem>>, vector<4x256xf32>,
    %c0_67 = arith.constant 0 : index
    %c17_68 = arith.constant 17 : index
    %80 = vector.load %arg7[%c0_67, %c17_68] : memref<4x290xf32, #tpu.memory_space<vmem>>, vector<4x256xf32>
    %c16_69 = arith.constant 16 : index
    %c0_70 = arith.constant 0 : index
    %81 = vector.load %arg8[%c16_69, %c0_70] : memref<36x256xf32, #tpu.memory_space<vmem>>, vector<4x256xf32>
    tpu.vector_store %arg8[%c16_69, %c0_70], %80 {strides = array<i32>} : memref<36x256xf32, #tpu.memory_space<vmem>>, vector<4x256xf32>,
    %c0_71 = arith.constant 0 : index
    %c18_72 = arith.constant 18 : index
    %82 = vector.load %arg7[%c0_71, %c18_72] : memref<4x290xf32, #tpu.memory_space<vmem>>, vector<4x256xf32>
    %cst_73 = arith.constant 0.000000e+00 : f32
    %83 = vector.broadcast %cst_73 : f32 to vector<4x256xf32>
    %84 = arith.select %20, %82, %83 : vector<4x256xi1>, vector<4x256xf32>
    %c20_74 = arith.constant 20 : index
    %c0_75 = arith.constant 0 : index
    %85 = vector.load %arg8[%c20_74, %c0_75] : memref<36x256xf32, #tpu.memory_space<vmem>>, vector<4x256xf32>
    tpu.vector_store %arg8[%c20_74, %c0_75], %84 {strides = array<i32>} : memref<36x256xf32, #tpu.memory_space<vmem>>, vector<4x256xf32>,
    %c0_76 = arith.constant 0 : index
    %c32_77 = arith.constant 32 : index
    %86 = vector.load %arg7[%c0_76, %c32_77] : memref<4x290xf32, #tpu.memory_space<vmem>>, vector<4x256xf32>
    %cst_78 = arith.constant 0.000000e+00 : f32
    %87 = vector.broadcast %cst_78 : f32 to vector<4x256xf32>
    %88 = arith.select %18, %86, %87 : vector<4x256xi1>, vector<4x256xf32>
    %c24_79 = arith.constant 24 : index
    %c0_80 = arith.constant 0 : index
    %89 = vector.load %arg8[%c24_79, %c0_80] : memref<36x256xf32, #tpu.memory_space<vmem>>, vector<4x256xf32>
    tpu.vector_store %arg8[%c24_79, %c0_80], %88 {strides = array<i32>} : memref<36x256xf32, #tpu.memory_space<vmem>>, vector<4x256xf32>,
    %c0_81 = arith.constant 0 : index
    %c33_82 = arith.constant 33 : index
    %90 = vector.load %arg7[%c0_81, %c33_82] : memref<4x290xf32, #tpu.memory_space<vmem>>, vector<4x256xf32>
    %c28_83 = arith.constant 28 : index
    %c0_84 = arith.constant 0 : index
    %91 = vector.load %arg8[%c28_83, %c0_84] : memref<36x256xf32, #tpu.memory_space<vmem>>, vector<4x256xf32>
    tpu.vector_store %arg8[%c28_83, %c0_84], %90 {strides = array<i32>} : memref<36x256xf32, #tpu.memory_space<vmem>>, vector<4x256xf32>,
    %c0_85 = arith.constant 0 : index
    %c34_86 = arith.constant 34 : index
    %92 = vector.load %arg7[%c0_85, %c34_86] : memref<4x290xf32, #tpu.memory_space<vmem>>, vector<4x256xf32>
    %cst_87 = arith.constant 0.000000e+00 : f32
    %93 = vector.broadcast %cst_87 : f32 to vector<4x256xf32>
    %94 = arith.select %20, %92, %93 : vector<4x256xi1>, vector<4x256xf32>
    %c32_88 = arith.constant 32 : index
    %c0_89 = arith.constant 0 : index
    %95 = vector.load %arg8[%c32_88, %c0_89] : memref<36x256xf32, #tpu.memory_space<vmem>>, vector<4x256xf32>
    tpu.vector_store %arg8[%c32_88, %c0_89], %94 {strides = array<i32>} : memref<36x256xf32, #tpu.memory_space<vmem>>, vector<4x256xf32>,
    %c0_90 = arith.constant 0 : index
    %c0_91 = arith.constant 0 : index
    %96 = vector.load %arg4[%c0_90, %c0_91] : memref<4x36xbf16, #tpu.memory_space<vmem>>, vector<4x36xbf16>
    %c0_92 = arith.constant 0 : index
    %c0_93 = arith.constant 0 : index
    %97 = vector.load %arg8[%c0_92, %c0_93] : memref<36x256xf32, #tpu.memory_space<vmem>>, vector<36x256xf32>
    %98 = arith.truncf %97 : vector<36x256xf32> to vector<36x256xbf16>
    %cst_94 = arith.constant dense<0.000000e+00> : vector<4x256xf32>
    %99 = tpu.matmul %96, %98, %cst_94 {dimension_numbers = #tpu.dot_dimension_numbers<[1], [0], [0], [1], [0, 0, 1, 1], [], []>} : vector<4x36xbf16>, vector<36x256xbf16>, vector<4x256xf32> -> vector<4x256xf32>
    %c0_95 = arith.constant 0 : index
    %c0_96 = arith.constant 0 : index
    %100 = vector.load %arg5[%c0_95, %c0_96] : memref<4x1xf32, #tpu.memory_space<vmem>>, vector<4x1xf32>
    %101 = vector.broadcast %100 : vector<4x1xf32> to vector<4x256xf32>
    %102 = arith.addf %99, %101 : vector<4x256xf32>
    %cst_97 = arith.constant 1.000000e-01 : f32
    %103 = vector.broadcast %cst_97 : f32 to vector<4x256xf32>
    %104 = arith.mulf %102, %103 : vector<4x256xf32>
    %105 = arith.addf %104, %24 : vector<4x256xf32>
    %c0_98 = arith.constant 0 : index
    %c0_99 = arith.constant 0 : index
    %c0_100 = arith.constant 0 : index
    %106 = vector.load %arg6[%c0_98, %c0_99, %c0_100] : memref<1x4x256xf32, #tpu.memory_space<vmem>>, vector<1x4x256xf32>
    %107 = vector.shape_cast %106 : vector<1x4x256xf32> to vector<4x256xf32>
    %108 = vector.shape_cast %105 : vector<4x256xf32> to vector<1x4x256xf32>
    tpu.vector_store %arg6[%c0_98, %c0_99, %c0_100], %108 {strides = array<i32>} : memref<1x4x256xf32, #tpu.memory_space<vmem>>, vector<1x4x256xf32>,
    return
  }
  func.func @transform_0(%arg0: i32) -> (i32, i32, i32) {
    %c0_i32 = arith.constant 0 : i32
    %c0_i32_0 = arith.constant 0 : i32
    %c0_i32_1 = arith.constant 0 : i32
    return %arg0, %c0_i32, %c0_i32_0 : i32, i32, i32
  }
  func.func @transform_1(%arg0: i32) -> (i32, i32) {
    %c0_i32 = arith.constant 0 : i32
    %c0_i32_0 = arith.constant 0 : i32
    %c0_i32_1 = arith.constant 0 : i32
    return %c0_i32, %c0_i32_0 : i32, i32
  }
  func.func @transform_2(%arg0: i32) -> (i32, i32) {
    %c0_i32 = arith.constant 0 : i32
    %c0_i32_0 = arith.constant 0 : i32
    %c0_i32_1 = arith.constant 0 : i32
    return %c0_i32, %c0_i32_0 : i32, i32
  }
  func.func @transform_3(%arg0: i32) -> (i32, i32) {
    %c0_i32 = arith.constant 0 : i32
    %c0_i32_0 = arith.constant 0 : i32
    %c0_i32_1 = arith.constant 0 : i32
    return %c0_i32, %c0_i32_0 : i32, i32
  }
  func.func @transform_4(%arg0: i32) -> (i32, i32) {
    %c0_i32 = arith.constant 0 : i32
    %c0_i32_0 = arith.constant 0 : i32
    %c0_i32_1 = arith.constant 0 : i32
    return %c0_i32, %c0_i32_0 : i32, i32
  }
  func.func @transform_5(%arg0: i32) -> (i32, i32, i32) {
    %c0_i32 = arith.constant 0 : i32
    %c0_i32_0 = arith.constant 0 : i32
    %c0_i32_1 = arith.constant 0 : i32
    return %arg0, %c0_i32, %c0_i32_0 : i32, i32, i32
  }
}

</mosaic_0001>

<bundles_post_ra>
// kernel: tpu_custom_call.1
= control target key start
LH: loop header
LB: loop body
LE: loop exit
PB: predicated region body
PF: predicated region fallthrough
CT: control target
= control target key end

     0   :  { %10 = vsyncpa [#allocation5], 0  ;;  %s1483_s0 = inlined_call_operand.hbm [shape: f32[2,4,256], index: 0, kind: input, shape index: {}]   ;;  %s1484_s1 = inlined_call_operand.vmem [shape: bf16[4,36], index: 1, kind: input, shape index: {}]   ;;  %s1485_s2 = inlined_call_operand.vmem [shape: f32[4,1], index: 2, kind: input, shape index: {}]   ;;  %s1486_s3 = inlined_call_operand.vmem [shape: bf16[4,36], index: 3, kind: input, shape index: {}]   ;;  %s1487_s4 = inlined_call_operand.vmem [shape: f32[4,1], index: 4, kind: input, shape index: {}]   ;;  %s1488_s5 = inlined_call_operand.hbm [shape: f32[2,4,256], index: 5, kind: output, shape index: {}]  }
   0x1   :  { %12 = vsyncpa [#allocation5 + $0x1], 0 }
   0x2   :  { %13 = vsyncpa [#allocation6], 0 }
   0x3   :  { %15 = vsyncpa [#allocation6 + $0x1], 0  ;;  %s1121_s18 = smov 0   ;;  %s1123_s19 = smov 0  }
   0x4   :  { %s1125_s20 = smov 0   ;;  %s1127_s21 = smov 0  }
   0x5 LB: > { %s1142_s22 = sadd.s32 4294967295, %s1076_s21   ;;  %s892_s23 = sadd.s32 4294967294, %s1076_s21   ;;  %s1076_s21 = sphi %s1127_s21, %s1516_s21   ;;  %s1072_s20 = sphi %s1125_s20, %s1515_s20   ;;  %s1068_s19 = sphi %s1123_s19, %s1514_s19   ;;  %s1064_s18 = sphi %s1121_s18, %s1513_s18  }
   0x6   : > { %s1146_s24 = sadd.s32 1, %s1076_s21   ;;  %s28_s25 = sadd.s32 1, %s1072_s20 }
   0x7   : > { %s25_s26 = ssub.s32 %s1076_s21, %s1146_s24  ;;  %p35_p0 = scmp.ne.s32.totalorder %s1072_s20, %s1068_s19 }
   0x8   : > { %p26_p1 = scmp.eq.s32.totalorder %s25_s26, 0  ;;  %p36_p2 = scmp.eq.s32.totalorder %s1076_s21, 0 }
   0x9   : > { %p41_p3 = scmp.ne.s32.totalorder %s1068_s19, %s1064_s18  ;;  %p42_p4 = scmp.eq.s32.totalorder %s1142_s22, 0 }
   0xa   : > { %s1158_s27 = scalar_select %p26_p1, %s1072_s20, %s28_s25  }
   0xb   : > { %p1160_p5 = por %p36_p2, %p35_p0  ;;  %p1164_p6 = por %p42_p4, %p41_p3 }
   0xc   : > { %p149_p7 = scmp.eq.s32.totalorder %s1142_s22, 1  ;;  %p155_p8 = scmp.eq.s32.totalorder %s892_s23, 1 }
   0xd   : > { %p924_p10 = scmp.lt.s32.totalorder %s1076_s21, 2  ;;  %s187_s7 = sand.u32 1, %s1072_s20  }
   0xe   : > { %p1171_p11 = por %p149_p7, %p35_p0  ;;  %p1175_p12 = por %p155_p8, %p41_p3 }
   0xf   : > { %s910_s8 = sshll.u32 %s1076_s21, 7  ;;  %s895_s9 = sshll.u32 %s187_s7, 3 }
  0x10   : > { %s1493_s30 = scalar_select %p1171_p11, 1, 0 }
  0x11   : > { %s1494_s6 = scalar_select %p1175_p12, 1, 0 }
  0x12   : > { %s1184_s12 = scalar_lea.hbm %s1483_s0, %s910_s8  ;;  %s191_s13 = scalar_lea.vmem [#allocation4], %s895_s9 }
  0x13   : > { %s199_s14 = sshll.u32 %s191_s13, 4  ;;  %p1188_p13 = pnand %p924_p10, %p1160_p5  ;;  %s1192_s14 = int_to_ptr.vmem [resolvable:$true] %s199_s14 }
  0x14   : > { %s188_s16 = scalar_lea.sflag [#allocation5], %s187_s7  ;;  %s980_s17 = scalar_lea.hbm %s1184_s12, 128 }
  0x15   : > { %p981_p2 = scmp.ne.s32.totalorder %s1184_s12, %s980_s17  ;;  %p982_p3 = pneg %p1188_p13 }
  0x16   : > { %s985_s26 = scalar_lea.hbm %s1483_s0, 256  ;;  %p986_p5 = scmp.lt.u32.totalorder %s1184_s12, %s1483_s0 }
  0x17   : > { %p983_p4 = pnand %p982_p3, %p981_p2  ;;  %p987_p8 = scmp.lt.u32.totalorder %s985_s26, %s980_s17 }
  0x18   : > { %p989_p9 = scmp.lt.u32.totalorder %s980_s17, %s1184_s12 }
  0x19   : > { %p984_p7 = pneg %p983_p4  ;;  %p988_p10 = por %p987_p8, %p986_p5 }
  0x1b   : > { %p990_p0 = por %p989_p9, %p988_p10 }
  0x1d   : > { %p991_p1 = pnand %p990_p0, %p984_p7 }
  0x1f   : > { %994 = shalt.err (!%p991_p1)
}
  0x20   : > { %s995_s7 = scalar_lea.vmem %s1192_s14, 128  ;;  %s1078_s9 = smov [#allocation4]  }
  0x21   : > { %p996_p2 = scmp.ne.s32.totalorder %s1192_s14, %s995_s7  ;;  %s1000_s10 = sshll.u32 %s1078_s9, 4  ;;  %s1001_s10 = int_to_ptr.vmem [resolvable:$false] %s1000_s10 }
  0x22   : > { %s1002_s11 = scalar_lea.vmem %s1001_s10, 256  ;;  %p1003_p11 = scmp.lt.s32.totalorder %s1192_s14, %s1001_s10 }
  0x23   : > { %p998_p4 = pnand %p996_p2, %p982_p3  ;;  %p1004_p5 = scmp.lt.s32.totalorder %s1002_s11, %s995_s7 }
  0x25   : > { %p999_p12 = pneg %p998_p4  ;;  %p1005_p8 = por %p1004_p5, %p1003_p11 }
  0x27   : > { %p1006_p9 = pnand %p1005_p8, %p999_p12 }
  0x29   : > { %1009 = shalt.err (!%p1006_p9)
}
  0x2a   : > { %919 = dma.hbm_to_vmem [thread:$0]  (!%p1188_p13), %s1184_s12, 128, %s1192_s14, %s188_s16  }
  0x2b   : > { %p1496_p0 = scmp.lt.s32.totalorder %s1076_s21, 3  ;;  %p1497_p1 = scmp.ge.s32.totalorder %s1076_s21, 1 }
  0x2d   : > { %p205_p3 = pnand %p1497_p1, %p1496_p0 }
  0x2e   : > { %s1226_s13 = sand.u32 (!%p205_p3), 1, %s1068_s19  }
  0x2f   : > { %208 = sbr.rel (%p205_p3) target bundleno = 1112 (0x458), region = 40  ;;  %s899_s17 = sshll.u32 (!%p205_p3), %s1226_s13, 3 }
  0x30   : > { %s211_s23 = scalar_lea.sflag (!%p205_p3), [#allocation5], %s1226_s13  ;;  %s214_s15 = scalar_lea.vmem (!%p205_p3), [#allocation4], %s899_s17 }
  0x36   : > { %1055 = dma.done.wait (%p1164_p6), %s211_s23, 128  }
  0x37   : > { %1057 = vsyncadd (%p1164_p6), %s211_s23, 4294967168  ;;  %vm274_vm0 = vcmask 273408   ;;  %v1079_v0 = vmov 0.0   ;;  %v1236_v1 = vld [vmem:[%s214_s15] sm:$0xff]  ;;  %s1080_s12 = smov 17   ;;  %v242_v2 = vlaneseq  ;;  %vm285_vm1 = vcmask 1043592  }
  0x38   : > { %273 = vst [vmem:[#allocation2] sm:$0xff] %v1079_v0  ;;  %275 = vst.msk [vmem:[#allocation2 + $0x8] sm:$0xf] %vm274_vm0, %v1079_v0  ;;  %278 = vrot.lane.b32.xlu0 %v1236_v1, %s1080_s12  ;;  %vm286_vm2 = vcmask 1047556   ;;  %vm281_vm3 = vcmask 138240   ;;  %vm289_vm4 = vcmask 134144  }
  0x39   : > { %v1240_v3 = vand.u32 127, %v242_v2  ;;  %vm1242_vm5 = vmor %vm286_vm2, %vm285_vm1  ;;  %s1081_s29 = smov 96   ;;  %s1082_s14 = smov 112   ;;  %v1089_v26 = vmov 0   ;;  %v484_v27 = vld [vmem:[%s1485_s2] sm:$0xf] }
  0x3a   : > { %s1083_s16 = smov 111   ;;  %s1084_s25 = smov 126   ;;  %533 = vmatprep.mubr.bf16.mxu0 %v1089_v26  ;;  %969 = vset.pattern.permute.xlu1 %v1089_v26  ;;  %vm311_vm8 = vcmask 1039360   ;;  %vm440_vm9 = vcmask 777216   ;;  %vm349_vm10 = vcmask 916480   ;;  %vm329_vm11 = vcmask 1031168  }
  0x3b   : > { %v1249_v8 = vadd.s32 128, %v1240_v3  ;;  %v249_v9 = vand.u32 15, %v1240_v3  ;;  %s1085_s26 = smov 110   ;;  %s1086_s28 = smov 127   ;;  %787 = vmatprep.mubr.bf16.mxu1 %v1089_v26  ;;  %970 = vset.pattern.permute.xlu0 %v1089_v26  ;;  %vm419_vm12 = vcmask 785408   ;;  %vm393_vm15 = vcmask 900096  }
  0x3c   : > { %s1087_s8 = smov 95   ;;  %s1088_s7 = smov 94   ;;  %vm375_vm0 = vcmask 908288   ;;  %vm1490_vm1 = vcmask 769024   ;;  %vm494_vm2 = vcmask 1041408  }
  0x3d   : > { %v256_v10 = vand.u32 15, %v1249_v8  ;;  %vm1257_vm6 = vcmp.ge.s32.totalorder %v249_v9, 1  ;;  %vm1309_vm13 = vcmp.le.s32.totalorder %v249_v9, 14  ;;  %v723_v54 = vld [vmem:[%s1486_s3] sm:$0x3]  ;;  %s808_s9 = scalar_lea.sflag [#allocation6], %s1226_s13 }
  0x3e   : > { %p1510_p11 = scmp.ne.s32.totalorder %s1493_s30, 0 }
  0x3f   : > { %vm1265_vm7 = vcmp.ge.s32.totalorder %v256_v10, 1  ;;  %vm1315_vm14 = vcmp.le.s32.totalorder %v256_v10, 14 }
  0xaa   : > { %v279_v4 = vpop.permute.xlu0 %278 }
  0xab   : > { %v280_v6 = vrot.slane %v279_v4, 4 }
  0xad   : > { %v282_v7 = vsel %vm281_vm3, %v280_v6, %v279_v4  ;;  %290 = vst.msk [vmem:[#allocation2 + $0x8] sm:$0xf] %vm289_vm4, %v280_v6 }
  0xae   : > { %288 = vst.msk [vmem:[#allocation2] sm:$0xff] %vm1242_vm5, %v282_v7 }
  0xb4   : > { %v409_v11 = vld [vmem:[#allocation2 + $0x8] sm:$0xf] }
  0xb5   : > { %v339_v12 = vld [vmem:[#allocation2 + $0x8] sm:$0xf]  ;;  %417 = vrot.lane.b32.xlu0 %v409_v11, %s1081_s29  ;;  %v299_v14 = vld [vmem:[#allocation2] sm:$0xff] }
  0xb6   : > { %347 = vrot.lane.b32.xlu1 %v339_v12, %s1082_s14  ;;  %v342_v16 = vcombine.high %v299_v14, %v299_v14  ;;  %v295_v17 = vsel %vm1257_vm6, %v299_v14, 0.0  ;;  %v365_v18 = vld [vmem:[#allocation2 + $0x8] sm:$0xf]  ;;  %v303_v24 = vcombine.low %v299_v14, %v299_v14 }
  0xb7   : > { %v319_v19 = vld [vmem:[#allocation2 + $0x8] sm:$0xf]  ;;  %297 = vst [vmem:[#allocation3] sm:$0xf] %v295_v17 }
  0xb8   : > { %v296_v20 = vsel %vm1265_vm7, %v342_v16, 0.0  ;;  %v383_v21 = vld [vmem:[#allocation2 + $0x8] sm:$0xf] }
  0xb9   : > { %373 = vrot.lane.b32.xlu0 %v365_v18, %s1083_s16  ;;  %298 = vst [vmem:[#allocation3 + $0x8] sm:$0xf] %v296_v20  ;;  %v972_v22 = vld [vmem:[#allocation2 + $0x8] ss:$0 sps:$4 sm:$0xff]  }
  0xba   : > { %327 = vrot.lane.b32.xlu1 %v319_v19, %s1084_s25  ;;  %v973_v23 = vld [vmem:[#allocation2 + $0x8] ss:$0 sps:$4 sm:$0xff]  }
  0xbb   : > { %v448_v25 = vld [vmem:[#allocation2 + $0x8] sm:$0xf] }
  0xbd   : > { %307 = vrot.lane.b32.xlu0 %v299_v14, %s1086_s28 }
  0xbe   : > { %391 = vrot.lane.b32.xlu1 %v383_v21, %s1085_s26 }
  0xc1   : > { %323 = vrot.lane.b32.xlu0 %v299_v14, %s1084_s25 }
  0xc2   : > { %343 = vrot.lane.b32.xlu1 %v299_v14, %s1082_s14 }
  0xc5   : > { %387 = vrot.lane.b32.xlu0 %v299_v14, %s1085_s26 }
  0xc6   : > { %413 = vrot.lane.b32.xlu1 %v299_v14, %s1081_s29 }
  0xc9   : > { %436 = vrot.lane.b32.xlu0 %v299_v14, %s1087_s8 }
  0xca   : > { %309 = vrot.lane.b32.xlu1 %v972_v22, %s1086_s28 }
  0xcd   : > { %369 = vrot.lane.b32.xlu0 %v299_v14, %s1083_s16 }
  0xce   : > { %438 = vrot.lane.b32.xlu1 %v973_v23, %s1087_s8 }
  0xd1   : > { %345 = vrot.lane.b32.xlu0 %v342_v16, %s1082_s14 }
  0xd2   : > { %305 = vrot.lane.b32.xlu1 %v303_v24, %s1086_s28 }
  0xd5   : > { %325 = vrot.lane.b32.xlu0 %v342_v16, %s1084_s25 }
  0xd6   : > { %415 = vrot.lane.b32.xlu1 %v342_v16, %s1081_s29 }
  0xd9   : > { %389 = vrot.lane.b32.xlu0 %v342_v16, %s1085_s26 }
  0xda   : > { %371 = vrot.lane.b32.xlu1 %v342_v16, %s1083_s16 }
  0xdd   : > { %452 = vrot.lane.b32.xlu0 %v299_v14, %s1088_s7 }
  0xde   : > { %434 = vrot.lane.b32.xlu1 %v303_v24, %s1087_s8 }
  0xe1   : > { %456 = vrot.lane.b32.xlu0 %v448_v25, %s1088_s7 }
  0xe2   : > { %454 = vrot.lane.b32.xlu1 %v342_v16, %s1088_s7 }
  0xe6   : > { %487 = vperm.xlu1 %969, %v484_v27  }
 0x127   : > { %v418_v28 = vpop.permute.xlu0 %417 }
 0x128   : > { %v348_v29 = vpop.permute.xlu1 %347 }
 0x12b   : > { %v374_v30 = vpop.permute.xlu0 %373 }
 0x12c   : > { %v328_v31 = vpop.permute.xlu1 %327 }
 0x12f   : > { %v308_v33 = vpop.permute.xlu0 %307 }
 0x130   : > { %v392_v32 = vpop.permute.xlu1 %391 }
 0x133   : > { %v324_v35 = vpop.permute.xlu0 %323 }
 0x134   : > { %v344_v34 = vpop.permute.xlu1 %343 }
 0x137   : > { %v388_v37 = vpop.permute.xlu0 %387 }
 0x138   : > { %v414_v36 = vpop.permute.xlu1 %413 }
 0x13b   : > { %v437_v39 = vpop.permute.xlu0 %436 }
 0x13c   : > { %v310_v38 = vpop.permute.xlu1 %309 }
 0x13d   : > { %v313_v40 = vsel %vm311_vm8, %v308_v33, %v310_v38 }
 0x13e   : > { %317 = vst [vmem:[#allocation3 + $0x8] sm:$0xf0] %v313_v40 }
 0x13f   : > { %v370_v42 = vpop.permute.xlu0 %369 }
 0x140   : > { %v439_v41 = vpop.permute.xlu1 %438 }
 0x141   : > { %v442_v43 = vsel %vm440_vm9, %v437_v39, %v439_v41  ;;  %v467_v41 = vld [vmem:[%s1484_s1] sm:$0x3] }
 0x142   : > { %446 = vst [vmem:[#allocation3 + $0x38] sm:$0xf0] %v442_v43 }
 0x143   : > { %v346_v44 = vpop.permute.xlu0 %345 }
 0x144   : > { %v306_v45 = vpop.permute.xlu1 %305  ;;  %v350_v46 = vsel %vm349_vm10, %v344_v34, %v346_v44  ;;  %v351_v47 = vsel %vm349_vm10, %v346_v44, %v348_v29 }
 0x145   : > { %v312_v48 = vsel %vm311_vm8, %v306_v45, %v308_v33  ;;  %v354_v49 = vsel %vm1257_vm6, %v350_v46, 0.0  ;;  %v355_v50 = vsel %vm1265_vm7, %v351_v47, 0.0  ;;  %v469_v18 = vld [vmem:[#allocation3 + $0x8] sm:$0xff] }
 0x146   : > { %316 = vst [vmem:[#allocation3] sm:$0xf0] %v312_v48  ;;  %v358_v51 = vrot.slane %v354_v49, 4  ;;  %v359_v52 = vrot.slane %v355_v50, 4 }
 0x147   : > { %v326_v55 = vpop.permute.xlu0 %325 }
 0x148   : > { %v416_v56 = vpop.permute.xlu1 %415  ;;  %362 = vst [vmem:[#allocation3 + $0x10] sm:$0xf0] %v358_v51  ;;  %363 = vst [vmem:[#allocation3 + $0x18] sm:$0xf0] %v359_v52  ;;  %v330_v57 = vsel %vm329_vm11, %v324_v35, %v326_v55  ;;  %v331_v58 = vsel %vm329_vm11, %v326_v55, %v328_v31 }
 0x149   : > { %v420_v59 = vsel %vm419_vm12, %v414_v36, %v416_v56  ;;  %v421_v60 = vsel %vm419_vm12, %v416_v56, %v418_v28  ;;  %v334_v61 = vsel %vm1309_vm13, %v330_v57, 0.0  ;;  %v335_v62 = vsel %vm1315_vm14, %v331_v58, 0.0 }
 0x14a   : > { %v424_v63 = vsel %vm1257_vm6, %v420_v59, 0.0  ;;  %v425_v0 = vsel %vm1265_vm7, %v421_v60, 0.0  ;;  %336 = vst [vmem:[#allocation3 + $0x10] sm:$0xf] %v334_v61  ;;  %337 = vst [vmem:[#allocation3 + $0x18] sm:$0xf] %v335_v62 }
 0x14b   : > { %426 = vst [vmem:[#allocation3 + $0x30] sm:$0xf] %v424_v63  ;;  %427 = vst [vmem:[#allocation3 + $0x38] sm:$0xf] %v425_v0  ;;  %v390_v2 = vpop.permute.xlu0 %389 }
 0x14c   : > { %v372_v3 = vpop.permute.xlu1 %371  ;;  %v394_v4 = vsel %vm393_vm15, %v388_v37, %v390_v2  ;;  %v395_v6 = vsel %vm393_vm15, %v390_v2, %v392_v32 }
 0x14d   : > { %v376_v7 = vsel %vm375_vm0, %v370_v42, %v372_v3  ;;  %v377_v8 = vsel %vm375_vm0, %v372_v3, %v374_v30  ;;  %v398_v9 = vsel %vm1309_vm13, %v394_v4, 0.0  ;;  %v399_v10 = vsel %vm1315_vm14, %v395_v6, 0.0  ;;  %v468_v20 = vld [vmem:[#allocation3] sm:$0xff] }
 0x14e   : > { %380 = vst [vmem:[#allocation3 + $0x20] sm:$0xf] %v376_v7  ;;  %381 = vst [vmem:[#allocation3 + $0x28] sm:$0xf] %v377_v8  ;;  %v402_v11 = vrot.slane %v398_v9, 4  ;;  %v403_v12 = vrot.slane %v399_v10, 4 }
 0x14f   : > { %v453_v14 = vpop.permute.xlu0 %452  ;;  %v740_v7 = vld [vmem:[%s1487_s4] sm:$0xf] }
 0x150   : > { %v435_v16 = vpop.permute.xlu1 %434  ;;  %406 = vst [vmem:[#allocation3 + $0x20] sm:$0xf0] %v402_v11  ;;  %407 = vst [vmem:[#allocation3 + $0x28] sm:$0xf0] %v403_v12 }
 0x151   : > { %v441_v17 = vsel %vm440_vm9, %v435_v16, %v437_v39  ;;  %v471_v19 = vld [vmem:[#allocation3 + $0x18] sm:$0xff]  ;;  %v470_v21 = vld [vmem:[#allocation3 + $0x10] sm:$0xff] }
 0x152   : > { %445 = vst [vmem:[#allocation3 + $0x30] sm:$0xf0] %v441_v17  ;;  %v479_v22 = vpack.c.bf16 %v471_v19, %v469_v18  ;;  %v478_v23 = vpack.c.bf16 %v470_v21, %v468_v20  ;;  %v475_v31 = vld [vmem:[#allocation3 + $0x38] sm:$0xff] }
 0x153   : > { %v457_v24 = vpop.permute.xlu0 %456 }
 0x154   : > { %v455_v25 = vpop.permute.xlu1 %454  ;;  %501 = vmatprep.subr.bf16.mxu0 %v479_v22 }
 0x155   : > { %v459_v26 = vsel %vm1490_vm1, %v453_v14, %v455_v25  ;;  %v460_v27 = vsel %vm1490_vm1, %v455_v25, %v457_v24  ;;  %502 = vmatpush1.bf16.msra.mxu0 %v478_v23  ;;  %vm490_vm1 = vcmask 293888  }
 0x156   : > { %v463_v28 = vsel %vm1309_vm13, %v459_v26, 0.0  ;;  %v464_v29 = vsel %vm1315_vm14, %v460_v27, 0.0 }
 0x157   : > { %465 = vst [vmem:[#allocation3 + $0x40] sm:$0xf] %v463_v28  ;;  %466 = vst [vmem:[#allocation3 + $0x48] sm:$0xf] %v464_v29  ;;  %v473_v30 = vld [vmem:[#allocation3 + $0x28] sm:$0xff]  ;;  %v472_v32 = vld [vmem:[#allocation3 + $0x20] sm:$0xff] }
 0x158   : > { %v481_v33 = vpack.c.bf16 %v475_v31, %v473_v30 }
 0x159   : > { %v474_v34 = vld [vmem:[#allocation3 + $0x30] sm:$0xff] }
 0x15a   : > { %v480_v35 = vpack.c.bf16 %v474_v34, %v472_v32  ;;  %503 = vmatprep.subr.bf16.mxu0 %v481_v33 }
 0x15c   : > { %504 = vmatpush1.bf16.msra.mxu0 %v480_v35 }
 0x15e   : > { %v477_v36 = vld [vmem:[#allocation3 + $0x48] sm:$0xf]  ;;  %v476_v37 = vld [vmem:[#allocation3 + $0x40] sm:$0xf] }
 0x15f   : > { %v483_v38 = vpack.c.bf16 %v477_v36, %v477_v36  ;;  %v482_v39 = vpack.c.bf16 %v476_v37, %v476_v37 }
 0x161   : > { %901 = vmatprep.subr.msk.bf16.mxu0 %vm494_vm2, %v483_v38  ;;  %v496_v40 = vsel %vm494_vm2, %v482_v39, 0 }
 0x162   : > { %506 = vmatpush1.bf16.msra.mxu0 %v496_v40 }
 0x165   : > { %902 = vmatmul.mubr.msk.bf16.vlgmr.msra.gmra.mrb[0].mxu0 %vm490_vm1, %v467_v41  ;;  %v488_v42 = vpop.permute.xlu1 %487 }
 0x238   : > { %v535_v43 = vpop.f32.mrb[0].mxu0 }
 0x239   : > { %v536_v44 = vadd.f32 %v535_v43, %v488_v42  ;;  %v537_v45 = vpop.f32.mrb[1].mxu0 }
 0x23a   : > { %v538_v46 = vadd.f32 %v537_v45, %v488_v42  ;;  %v539_v47 = vpop.f32.mrb[2].mxu0 }
 0x23b   : > { %v542_v48 = vmax.f32 %v536_v44, 0.0  ;;  %v540_v49 = vpop.f32.mrb[3].mxu0 }
 0x23c   : > { %v543_v50 = vmax.f32 %v538_v46, 0.0 }
 0x23e   : > { %v546_v51 = vcombine.low %v542_v48, %v543_v50 }
 0x240   : > { %547 = vrot.lane.b32.xlu0 %v546_v51, %s1080_s12 }
 0x2b2   : > { %v548_v52 = vpop.permute.xlu0 %547 }
 0x2b3   : > { %v549_v55 = vrot.slane %v548_v52, 4 }
 0x2b5   : > { %v550_v56 = vsel %vm281_vm3, %v549_v55, %v548_v52  ;;  %554 = vst.msk [vmem:[#allocation2 + $0x8] sm:$0xf] %vm289_vm4, %v549_v55  ;;  %vm1508_vm3 = vcmask 769024  }
 0x2b6   : > { %553 = vst.msk [vmem:[#allocation2] sm:$0xff] %vm1242_vm5, %v550_v56  ;;  %vm1509_vm4 = vmmov %vm1508_vm3 }
 0x2bc   : > { %v601_v57 = vld [vmem:[#allocation2 + $0x8] sm:$0xf] }
 0x2bd   : > { %v582_v58 = vld [vmem:[#allocation2 + $0x8] sm:$0xf]  ;;  %609 = vrot.lane.b32.xlu0 %v601_v57, %s1082_s14  ;;  %v600_v59 = vld [vmem:[#allocation2] sm:$0xff] }
 0x2be   : > { %590 = vrot.lane.b32.xlu1 %v582_v58, %s1084_s25  ;;  %v604_v60 = vcombine.high %v600_v59, %v600_v59  ;;  %v559_v61 = vsel %vm1257_vm6, %v600_v59, 0.0  ;;  %v668_v62 = vld [vmem:[#allocation2 + $0x8] sm:$0xf]  ;;  %v567_v4 = vcombine.low %v600_v59, %v600_v59 }
 0x2bf   : > { %v643_v63 = vld [vmem:[#allocation2 + $0x8] sm:$0xf]  ;;  %561 = vst [vmem:[#allocation3] sm:$0xf] %v559_v61 }
 0x2c0   : > { %v560_v0 = vsel %vm1265_vm7, %v604_v60, 0.0  ;;  %v626_v5 = vld [vmem:[#allocation2 + $0x8] sm:$0xf] }
 0x2c1   : > { %676 = vrot.lane.b32.xlu0 %v668_v62, %s1081_s29  ;;  %562 = vst [vmem:[#allocation3 + $0x8] sm:$0xf] %v560_v0  ;;  %v978_v2 = vld [vmem:[#allocation2 + $0x8] ss:$0 sps:$4 sm:$0xff]  }
 0x2c2   : > { %651 = vrot.lane.b32.xlu1 %v643_v63, %s1085_s26  ;;  %v979_v3 = vld [vmem:[#allocation2 + $0x8] ss:$0 sps:$4 sm:$0xff]  }
 0x2c3   : > { %v705_v6 = vld [vmem:[#allocation2 + $0x8] sm:$0xf] }
 0x2c5   : > { %634 = vrot.lane.b32.xlu0 %v626_v5, %s1083_s16 }
 0x2c6   : > { %605 = vrot.lane.b32.xlu1 %v600_v59, %s1082_s14 }
 0x2c9   : > { %571 = vrot.lane.b32.xlu0 %v600_v59, %s1086_s28 }
 0x2ca   : > { %672 = vrot.lane.b32.xlu1 %v600_v59, %s1081_s29 }
 0x2cd   : > { %586 = vrot.lane.b32.xlu0 %v600_v59, %s1084_s25 }
 0x2ce   : > { %573 = vrot.lane.b32.xlu1 %v978_v2, %s1086_s28 }
 0x2d1   : > { %647 = vrot.lane.b32.xlu0 %v600_v59, %s1085_s26 }
 0x2d2   : > { %696 = vrot.lane.b32.xlu1 %v979_v3, %s1087_s8 }
 0x2d5   : > { %694 = vrot.lane.b32.xlu0 %v600_v59, %s1087_s8 }
 0x2d6   : > { %607 = vrot.lane.b32.xlu1 %v604_v60, %s1082_s14 }
 0x2d9   : > { %630 = vrot.lane.b32.xlu0 %v600_v59, %s1083_s16 }
 0x2da   : > { %569 = vrot.lane.b32.xlu1 %v567_v4, %s1086_s28 }
 0x2dd   : > { %588 = vrot.lane.b32.xlu0 %v604_v60, %s1084_s25  ;;  %s240_s25 = scalar_lea.vmem [#allocation7], %s899_s17 }
 0x2de   : > { %674 = vrot.lane.b32.xlu1 %v604_v60, %s1081_s29 }
 0x2e1   : > { %649 = vrot.lane.b32.xlu0 %v604_v60, %s1085_s26  ;;  %s822_s26 = sshll.u32 %s240_s25, 4  ;;  %s1441_s26 = int_to_ptr.vmem [resolvable:$true] %s822_s26 }
 0x2e2   : > { %632 = vrot.lane.b32.xlu1 %v604_v60, %s1083_s16  ;;  %s911_s16 = sshll.u32 %s1142_s22, 7  ;;  %s1010_s10 = scalar_lea.vmem %s1441_s26, 128 }
 0x2e3   : > { %p1011_p6 = scmp.ne.s32.totalorder %s1441_s26, %s1010_s10  ;;  %s1090_s22 = smov [#allocation7]  }
 0x2e4   : > { %s1014_s17 = sshll.u32 %s1090_s22, 4  ;;  %s1015_s17 = int_to_ptr.vmem [resolvable:$false] %s1014_s17 }
 0x2e5   : > { %709 = vrot.lane.b32.xlu0 %v600_v59, %s1088_s7  ;;  %p1012_p12 = pnand %p1011_p6, %p1510_p11  ;;  %s1016_s11 = scalar_lea.vmem %s1015_s17, 256 }
 0x2e6   : > { %692 = vrot.lane.b32.xlu1 %v567_v4, %s1087_s8  ;;  %p1017_p7 = scmp.lt.s32.totalorder %s1441_s26, %s1015_s17  ;;  %p1018_p10 = scmp.lt.s32.totalorder %s1016_s11, %s1010_s10 }
 0x2e7   : > { %p1013_p13 = pneg %p1012_p12 }
 0x2e8   : > { %p1019_p2 = por %p1018_p10, %p1017_p7 }
 0x2e9   : > { %713 = vrot.lane.b32.xlu0 %v705_v6, %s1088_s7 }
 0x2ea   : > { %711 = vrot.lane.b32.xlu1 %v604_v60, %s1088_s7  ;;  %s1439_s7 = scalar_lea.hbm %s1488_s5, %s911_s16  ;;  %p1020_p4 = pnand %p1019_p2, %p1013_p13 }
 0x2ee   : > { %743 = vperm.xlu1 %969, %v740_v7  }
 0x32f   : > { %v610_v8 = vpop.permute.xlu0 %609 }
 0x330   : > { %v591_v9 = vpop.permute.xlu1 %590 }
 0x333   : > { %v677_v10 = vpop.permute.xlu0 %676 }
 0x334   : > { %v652_v11 = vpop.permute.xlu1 %651 }
 0x337   : > { %v635_v12 = vpop.permute.xlu0 %634 }
 0x338   : > { %v606_v14 = vpop.permute.xlu1 %605 }
 0x33b   : > { %v572_v17 = vpop.permute.xlu0 %571 }
 0x33c   : > { %v673_v16 = vpop.permute.xlu1 %672 }
 0x33f   : > { %v587_v19 = vpop.permute.xlu0 %586 }
 0x340   : > { %v574_v18 = vpop.permute.xlu1 %573 }
 0x341   : > { %v576_v20 = vsel %vm311_vm8, %v572_v17, %v574_v18 }
 0x342   : > { %580 = vst [vmem:[#allocation3 + $0x8] sm:$0xf0] %v576_v20 }
 0x343   : > { %v648_v22 = vpop.permute.xlu0 %647 }
 0x344   : > { %v697_v21 = vpop.permute.xlu1 %696 }
 0x347   : > { %v695_v24 = vpop.permute.xlu0 %694 }
 0x348   : > { %v608_v23 = vpop.permute.xlu1 %607  ;;  %v699_v27 = vsel %vm440_vm9, %v695_v24, %v697_v21 }
 0x349   : > { %v611_v25 = vsel %vm349_vm10, %v606_v14, %v608_v23  ;;  %v612_v26 = vsel %vm349_vm10, %v608_v23, %v610_v8  ;;  %703 = vst [vmem:[#allocation3 + $0x38] sm:$0xf0] %v699_v27  ;;  %v725_v58 = vld [vmem:[#allocation3 + $0x8] sm:$0xff]  ;;  %v798_v23 = vcombine.high %v1236_v1, %v1236_v1 }
 0x34a   : > { %v615_v28 = vsel %vm1257_vm6, %v611_v25, 0.0  ;;  %v616_v29 = vsel %vm1265_vm7, %v612_v26, 0.0 }
 0x34b   : > { %v619_v30 = vrot.slane %v615_v28, 4  ;;  %v620_v31 = vrot.slane %v616_v29, 4  ;;  %v631_v32 = vpop.permute.xlu0 %630 }
 0x34c   : > { %v570_v33 = vpop.permute.xlu1 %569 }
 0x34d   : > { %623 = vst [vmem:[#allocation3 + $0x10] sm:$0xf0] %v619_v30  ;;  %624 = vst [vmem:[#allocation3 + $0x18] sm:$0xf0] %v620_v31  ;;  %v575_v34 = vsel %vm311_vm8, %v570_v33, %v572_v17 }
 0x34e   : > { %579 = vst [vmem:[#allocation3] sm:$0xf0] %v575_v34 }
 0x34f   : > { %v589_v35 = vpop.permute.xlu0 %588 }
 0x350   : > { %v675_v36 = vpop.permute.xlu1 %674  ;;  %v592_v37 = vsel %vm329_vm11, %v587_v19, %v589_v35  ;;  %v593_v38 = vsel %vm329_vm11, %v589_v35, %v591_v9 }
 0x351   : > { %v678_v39 = vsel %vm419_vm12, %v673_v16, %v675_v36  ;;  %v679_v40 = vsel %vm419_vm12, %v675_v36, %v677_v10  ;;  %v596_v41 = vsel %vm1309_vm13, %v592_v37, 0.0  ;;  %v597_v42 = vsel %vm1315_vm14, %v593_v38, 0.0 }
 0x352   : > { %v682_v43 = vsel %vm1257_vm6, %v678_v39, 0.0  ;;  %v683_v44 = vsel %vm1265_vm7, %v679_v40, 0.0  ;;  %598 = vst [vmem:[#allocation3 + $0x10] sm:$0xf] %v596_v41  ;;  %599 = vst [vmem:[#allocation3 + $0x18] sm:$0xf] %v597_v42 }
 0x353   : > { %684 = vst [vmem:[#allocation3 + $0x30] sm:$0xf] %v682_v43  ;;  %685 = vst [vmem:[#allocation3 + $0x38] sm:$0xf] %v683_v44  ;;  %v650_v45 = vpop.permute.xlu0 %649 }
 0x354   : > { %v633_v46 = vpop.permute.xlu1 %632  ;;  %v653_v47 = vsel %vm393_vm15, %v648_v22, %v650_v45  ;;  %v654_v48 = vsel %vm393_vm15, %v650_v45, %v652_v11 }
 0x355   : > { %v636_v49 = vsel %vm375_vm0, %v631_v32, %v633_v46  ;;  %v637_v50 = vsel %vm375_vm0, %v633_v46, %v635_v12  ;;  %v657_v13 = vsel %vm1309_vm13, %v653_v47, 0.0  ;;  %v658_v15 = vsel %vm1315_vm14, %v654_v48, 0.0  ;;  %v724_v60 = vld [vmem:[#allocation3] sm:$0xff] }
 0x356   : > { %640 = vst [vmem:[#allocation3 + $0x20] sm:$0xf] %v636_v49  ;;  %641 = vst [vmem:[#allocation3 + $0x28] sm:$0xf] %v637_v50  ;;  %v661_v51 = vrot.slane %v657_v13, 4  ;;  %v662_v52 = vrot.slane %v658_v15, 4 }
 0x357   : > { %v710_v55 = vpop.permute.xlu0 %709 }
 0x358   : > { %v693_v56 = vpop.permute.xlu1 %692  ;;  %665 = vst [vmem:[#allocation3 + $0x20] sm:$0xf0] %v661_v51  ;;  %666 = vst [vmem:[#allocation3 + $0x28] sm:$0xf0] %v662_v52 }
 0x359   : > { %v698_v57 = vsel %vm440_vm9, %v693_v56, %v695_v24  ;;  %v727_v59 = vld [vmem:[#allocation3 + $0x18] sm:$0xff]  ;;  %v726_v61 = vld [vmem:[#allocation3 + $0x10] sm:$0xff] }
 0x35a   : > { %702 = vst [vmem:[#allocation3 + $0x30] sm:$0xf0] %v698_v57  ;;  %v735_v62 = vpack.c.bf16 %v727_v59, %v725_v58  ;;  %v734_v63 = vpack.c.bf16 %v726_v61, %v724_v60  ;;  %v731_v8 = vld [vmem:[#allocation3 + $0x38] sm:$0xff] }
 0x35b   : > { %v714_v0 = vpop.permute.xlu0 %713 }
 0x35c   : > { %v712_v5 = vpop.permute.xlu1 %711  ;;  %755 = vmatprep.subr.bf16.mxu1 %v735_v62 }
 0x35d   : > { %v715_v2 = vsel %vm1508_vm3, %v710_v55, %v712_v5  ;;  %v716_v3 = vsel %vm1509_vm4, %v712_v5, %v714_v0  ;;  %756 = vmatpush1.bf16.msra.mxu1 %v734_v63 }
 0x35e   : > { %v719_v4 = vsel %vm1309_vm13, %v715_v2, 0.0  ;;  %v720_v6 = vsel %vm1315_vm14, %v716_v3, 0.0 }
 0x35f   : > { %721 = vst [vmem:[#allocation3 + $0x40] sm:$0xf] %v719_v4  ;;  %722 = vst [vmem:[#allocation3 + $0x48] sm:$0xf] %v720_v6  ;;  %v729_v7 = vld [vmem:[#allocation3 + $0x28] sm:$0xff]  ;;  %v728_v9 = vld [vmem:[#allocation3 + $0x20] sm:$0xff] }
 0x360   : > { %v737_v10 = vpack.c.bf16 %v731_v8, %v729_v7 }
 0x361   : > { %v730_v11 = vld [vmem:[#allocation3 + $0x30] sm:$0xff] }
 0x362   : > { %v736_v12 = vpack.c.bf16 %v730_v11, %v728_v9  ;;  %757 = vmatprep.subr.bf16.mxu1 %v737_v10 }
 0x364   : > { %758 = vmatpush1.bf16.msra.mxu1 %v736_v12 }
 0x366   : > { %v733_v14 = vld [vmem:[#allocation3 + $0x48] sm:$0xf]  ;;  %v732_v16 = vld [vmem:[#allocation3 + $0x40] sm:$0xf] }
 0x367   : > { %v739_v17 = vpack.c.bf16 %v733_v14, %v733_v14  ;;  %v738_v18 = vpack.c.bf16 %v732_v16, %v732_v16 }
 0x369   : > { %903 = vmatprep.subr.msk.bf16.mxu1 %vm494_vm2, %v739_v17  ;;  %v750_v53 = vsel %vm494_vm2, %v738_v18, 0 }
 0x36a   : > { %760 = vmatpush1.bf16.msra.mxu1 %v750_v53 }
 0x36d   : > { %904 = vmatmul.mubr.msk.bf16.vlgmr.msra.gmra.mrb[0].mxu1 %vm490_vm1, %v723_v54  ;;  %v744_v19 = vpop.permute.xlu1 %743 }
 0x440   : > { %v789_v20 = vpop.f32.mrb[0].mxu1 }
 0x441   : > { %v790_v21 = vadd.f32 %v789_v20, %v744_v19  ;;  %v791_v22 = vpop.f32.mrb[1].mxu1 }
 0x442   : > { %v792_v24 = vadd.f32 %v791_v22, %v744_v19  ;;  %v793_v25 = vpop.f32.mrb[2].mxu1 }
 0x443   : > { %v796_v26 = vmul.f32 0.1, %v790_v21  ;;  %v794_v27 = vpop.f32.mrb[3].mxu1 }
 0x444   : > { %v797_v28 = vmul.f32 0.1, %v792_v24 }
 0x445   : > { %v800_v29 = vadd.f32 %v796_v26, %v1236_v1 }
 0x446   : > { %v801_v30 = vadd.f32 %v798_v23, %v797_v28 }
 0x448   : > { %v804_v31 = vcombine.low %v800_v29, %v801_v30 }
 0x44a   : > { %806 = vst [vmem:[%s240_s25] sm:$0xff] %v804_v31 }
 0x44b   : > { %1023 = shalt.err (!%p1020_p4)
}
 0x44c   : > { %s1024_s13 = scalar_lea.hbm %s1439_s7, 128  ;;  %s1028_s12 = scalar_lea.hbm %s1488_s5, 256 }
 0x44d   : > { %p1025_p5 = scmp.ne.s32.totalorder %s1439_s7, %s1024_s13  ;;  %p1029_p0 = scmp.lt.u32.totalorder %s1439_s7, %s1488_s5 }
 0x44e   : > { %p1030_p1 = scmp.lt.u32.totalorder %s1028_s12, %s1024_s13  ;;  %p1032_p6 = scmp.lt.u32.totalorder %s1024_s13, %s1439_s7 }
 0x44f   : > { %p1026_p8 = pnand %p1025_p5, %p1510_p11 }
 0x450   : > { %p1031_p3 = por %p1030_p1, %p1029_p0 }
 0x451   : > { %p1027_p9 = pneg %p1026_p8 }
 0x452   : > { %p1033_p12 = por %p1032_p6, %p1031_p3 }
 0x454   : > { %p1034_p13 = pnand %p1033_p12, %p1027_p9 }
 0x456   : > { %1037 = shalt.err (!%p1034_p13)
}
 0x457   : > { %914 = dma.vmem_to_hbm [thread:$0]  (%p1510_p11), %s1441_s26, 128, %s1439_s7, %s808_s9  }
 0x458 PF: > { %s834_s16 = sand.u32 1, %s1064_s18   ;;  %p1511_p7 = scmp.ne.s32.totalorder %s1494_s6, 0 }
 0x459   : > { %p1512_p10 = scmp.ge.s32.totalorder %s1076_s21, 2  ;;  %s835_s25 = scalar_lea.sflag [#allocation6], %s834_s16 }
 0x45b   : > { %p921_p2 = pnand %p1512_p10, %p1511_p7 }
 0x45d   : > { %1059 = dma.done.wait (!%p921_p2), %s835_s25, 128  }
 0x45e   : > { %1061 = vsyncadd (!%p921_p2), %s835_s25, 4294967168  ;;  %p18_p4 = scmp.ge.s32.totalorder %s1146_s24, 4   ;;  %s1513_s18 = smov %s1068_s19 }
 0x45f   : > { %s1514_s19 = smov %s1072_s20  ;;  %s1515_s20 = smov %s1158_s27 }
 0x460   : > { %s1516_s21 = smov %s1146_s24  ;;  %20 = sbr.rel (!%p18_p4) target bundleno = 5 (0x5), region = 85 }
 0x467   :  { %840 = vsyncpa [#allocation5], 1 }
 0x468   :  { %842 = vsyncpa [#allocation5 + $0x1], 1 }
 0x469   :  { %843 = vsyncpa [#allocation6], 1 }
 0x46a   :  { %845 = vsyncpa [#allocation6 + $0x1], 1 }

</bundles_post_ra>
